<compile_context>
chip_gen: v7x
topology: tpu7x:2x2x1
jax: 0.10.0
libtpu: 0.0.40
codegen_flags: <defaults>
</compile_context>

<pallas_src>
import jax
import jax.numpy as jnp
from jax.experimental import pallas as pl
from jax.experimental.pallas import tpu as pltpu


def _round_up(n: int, m: int) -> int:
    return ((n + m - 1) // m) * m


def _choose_tile(batch: int, batch_tile: int) -> int:
    """MXU/sublane-friendly batch (M) tile.

    - multiple of 16 rows (one bf16 vreg holds 16 sublanes);
    - never larger than the 16-rounded-down batch (so the last grid step is a
      partial, masked block rather than a block exceeding the array) -- the
      only exception is batch < 16, which the wrapper minimally pads;
    - for mid/large batches force >= 2 grid steps so both v7x TensorCores get
      work on the "parallel" batch axis.
    """
    tile = min(batch_tile, max(16, (batch // 16) * 16))
    if batch > 256 and -(-batch // tile) < 2:  # cdiv(batch, tile) == 1
        tile = _round_up(-(-batch // 2), 128)
    return tile


def agent_nn_kernel(x_ref, w1_ref, b1_ref, w2_ref, b2_ref, w3_ref, b3_ref, o_ref):
    """Fused 3-layer MLP: tanh(relu(relu(x@W1+b1)@W2+b2)@W3+b3).

    bf16 MXU operands, f32 accumulation; bias/ReLU/tanh in f32; bf16 store.
    Dropout layers are identity (eval mode).
    """
    x = x_ref[...].astype(jnp.bfloat16)  # free on the VPU; kernel is HBM-bound

    # Layer 1: Linear(input_size -> hidden_size) + ReLU  (Dropout = identity)
    h1 = jnp.dot(x, w1_ref[...], preferred_element_type=jnp.float32) + b1_ref[...]
    h1 = jnp.maximum(h1, 0.0)

    # Layer 2: Linear(hidden_size -> hidden_size // 2) + ReLU  (Dropout = identity)
    h2 = jnp.dot(h1.astype(jnp.bfloat16), w2_ref[...],
                 preferred_element_type=jnp.float32) + b2_ref[...]
    h2 = jnp.maximum(h2, 0.0)

    # Layer 3: Linear(hidden_size // 2 -> output_size, lane-padded) + Tanh
    h3 = jnp.dot(h2.astype(jnp.bfloat16), w3_ref[...],
                 preferred_element_type=jnp.float32) + b3_ref[...]
    o_ref[...] = jnp.tanh(h3).astype(o_ref.dtype)


def make_agent_nn_forward(w1, b1, w2, b2, w3, b3, *,
                          batch_tile: int = 1024,
                          out_dtype=jnp.bfloat16):
    """Returns a jitted forward(x) closure with weights pre-cast / lane-padded.

    Weights are stored [in, out] (== PyTorch `x @ W.T + b`).  Pass x as f32 or
    bf16; bf16 halves the kernel's dominant HBM read.
    """
    D_in, H1 = w1.shape
    H2 = w2.shape[1]
    D_out = w3.shape[1]
    D_out_p = _round_up(D_out, 128)  # lane-dense output (unmasked vst)

    # One-time weight prep (bf16 for the MXU, W3/b3 zero-padded to 128 lanes).
    w1b = jnp.asarray(w1, jnp.bfloat16)
    w2b = jnp.asarray(w2, jnp.bfloat16)
    w3p = jnp.zeros((H2, D_out_p), jnp.bfloat16).at[:, :D_out].set(
        jnp.asarray(w3, jnp.bfloat16))
    b1f = jnp.asarray(b1, jnp.float32).reshape(1, H1)
    b2f = jnp.asarray(b2, jnp.float32).reshape(1, H2)
    b3p = jnp.zeros((1, D_out_p), jnp.float32).at[:, :D_out].set(
        jnp.asarray(b3, jnp.float32).reshape(1, D_out))

    @jax.jit
    def forward(x):
        B = x.shape[0]
        tile = _choose_tile(B, batch_tile)

        # Only tiny batches (< 16 rows) need a (negligible) pad; everything
        # else is handled by Pallas' partial last block -- no full-batch copy.
        xk = x
        if B < tile:
            xk = jnp.zeros((tile, D_in), x.dtype).at[:B].set(x)
        Bp = xk.shape[0]
        grid = (pl.cdiv(Bp, tile),)

        flops = 2 * Bp * (D_in * H1 + H1 * H2 + H2 * D_out_p)
        bytes_accessed = (
            xk.size * xk.dtype.itemsize
            + w1b.size * 2 + w2b.size * 2 + w3p.size * 2
            + b1f.size * 4 + b2f.size * 4 + b3p.size * 4
            + Bp * D_out_p * jnp.dtype(out_dtype).itemsize
        )
        cost = pl.CostEstimate(flops=flops,
                               transcendentals=Bp * D_out_p,
                               bytes_accessed=bytes_accessed)

        out = pl.pallas_call(
            agent_nn_kernel,
            out_shape=jax.ShapeDtypeStruct((Bp, D_out_p), out_dtype),
            grid_spec=pltpu.PrefetchScalarGridSpec(
                num_scalar_prefetch=0,
                grid=grid,
                in_specs=[
                    # activations: tiled over batch
                    pl.BlockSpec((tile, D_in), lambda i: (i, 0)),
                    # weights / biases: whole array, resident across the grid
                    pl.BlockSpec((D_in, H1), lambda i: (0, 0)),
                    pl.BlockSpec((1, H1), lambda i: (0, 0)),
                    pl.BlockSpec((H1, H2), lambda i: (0, 0)),
                    pl.BlockSpec((1, H2), lambda i: (0, 0)),
                    pl.BlockSpec((H2, D_out_p), lambda i: (0, 0)),
                    pl.BlockSpec((1, D_out_p), lambda i: (0, 0)),
                ],
                out_specs=pl.BlockSpec((tile, D_out_p), lambda i: (i, 0)),
            ),
            compiler_params=pltpu.CompilerParams(
                dimension_semantics=("parallel",),
            ),
            cost_estimate=cost,
        )(xk, w1b, b1f, w2b, b2f, w3p, b3p)

        # Slice away (tiny-batch) row padding and output-lane padding.
        return out[:B, :D_out]

    return forward


def init_params(key, input_size=768, hidden_size=256, output_size=64):
    """Deterministic init mimicking nn.Linear (weights stored [in, out])."""
    h2 = hidden_size // 2
    k = jax.random.split(key, 6)

    def linear(kw, kb, fan_in, fan_out):
        bound = 1.0 / jnp.sqrt(fan_in)
        w = jax.random.uniform(kw, (fan_in, fan_out), jnp.float32, -bound, bound)
        b = jax.random.uniform(kb, (fan_out,), jnp.float32, -bound, bound)
        return w, b

    w1, b1 = linear(k[0], k[1], input_size, hidden_size)
    w2, b2 = linear(k[2], k[3], hidden_size, h2)
    w3, b3 = linear(k[4], k[5], h2, output_size)
    return w1, b1, w2, b2, w3, b3


if __name__ == "__main__":
    input_size, hidden_size, output_size = 768, 256, 64
    batch = 20  # not a tile multiple -> exercises multi-step grid + partial block

    key = jax.random.PRNGKey(0)
    k_x, k_p = jax.random.split(key)

    x = jax.random.normal(k_x, (batch, input_size), dtype=jnp.float32)
    params = init_params(k_p, input_size, hidden_size, output_size)

    # Small tile so the functional test runs a 2-step grid with a masked
    # partial last block; the default (1024) is the performance configuration.
    forward = make_agent_nn_forward(*params, batch_tile=16)
    out = jax.block_until_ready(forward(x))

    # Cross-check against plain-JAX f32 reference (bf16 operands/output => loose tol)
    w1, b1, w2, b2, w3, b3 = params
    ref = jnp.tanh(
        jnp.maximum(jnp.maximum(x @ w1 + b1, 0.0) @ w2 + b2, 0.0) @ w3 + b3
    )
    assert out.shape == (batch, output_size), out.shape
    out_f32 = out.astype(jnp.float32)
    assert jnp.allclose(out_f32, ref, atol=4e-2, rtol=4e-2), (
        float(jnp.max(jnp.abs(out_f32 - ref)))
    )

    print("KERNEL_OK")
</pallas_src>

<mosaic_0001>
module attributes {stable_mosaic.version = 11 : i64} {
  func.func @agent_nn_kernel(%arg0: i32, %arg1: memref<16x768xf32, #tpu.memory_space<vmem>>, %arg2: memref<768x256xbf16, #tpu.memory_space<vmem>>, %arg3: memref<1x256xf32, #tpu.memory_space<vmem>>, %arg4: memref<256x128xbf16, #tpu.memory_space<vmem>>, %arg5: memref<1x128xf32, #tpu.memory_space<vmem>>, %arg6: memref<128x128xbf16, #tpu.memory_space<vmem>>, %arg7: memref<1x128xf32, #tpu.memory_space<vmem>>, %arg8: memref<16x128xbf16, #tpu.memory_space<vmem>>) attributes {dimension_semantics = [#tpu.dimension_semantics<parallel>], iteration_bounds = array<i64: 2>, scalar_prefetch = 0 : i64, scratch_operands = 0 : i64, tpu.core_type = #tpu.core_type<tc>, window_params = [{transform_indices = @transform_0, window_bounds = array<i64: 16, 768>}, {pipeline_mode = #tpu.pipeline_mode<synchronous>, transform_indices = @transform_1, window_bounds = array<i64: 768, 256>}, {pipeline_mode = #tpu.pipeline_mode<synchronous>, transform_indices = @transform_2, window_bounds = array<i64: 1, 256>}, {pipeline_mode = #tpu.pipeline_mode<synchronous>, transform_indices = @transform_3, window_bounds = array<i64: 256, 128>}, {pipeline_mode = #tpu.pipeline_mode<synchronous>, transform_indices = @transform_4, window_bounds = array<i64: 1, 128>}, {pipeline_mode = #tpu.pipeline_mode<synchronous>, transform_indices = @transform_5, window_bounds = array<i64: 128, 128>}, {pipeline_mode = #tpu.pipeline_mode<synchronous>, transform_indices = @transform_6, window_bounds = array<i64: 1, 128>}, {transform_indices = @transform_7, window_bounds = array<i64: 16, 128>}]} {
    %c0 = arith.constant 0 : index
    %c0_0 = arith.constant 0 : index
    %0 = vector.load %arg1[%c0, %c0_0] : memref<16x768xf32, #tpu.memory_space<vmem>>, vector<16x768xf32>
    %1 = arith.truncf %0 : vector<16x768xf32> to vector<16x768xbf16>
    %c0_1 = arith.constant 0 : index
    %c0_2 = arith.constant 0 : index
    %2 = vector.load %arg2[%c0_1, %c0_2] : memref<768x256xbf16, #tpu.memory_space<vmem>>, vector<768x256xbf16>
    %cst = arith.constant dense<0.000000e+00> : vector<16x256xf32>
    %3 = tpu.matmul %1, %2, %cst {dimension_numbers = #tpu.dot_dimension_numbers<[1], [0], [0], [1], [0, 0, 1, 1], [], []>} : vector<16x768xbf16>, vector<768x256xbf16>, vector<16x256xf32> -> vector<16x256xf32>
    %c0_3 = arith.constant 0 : index
    %c0_4 = arith.constant 0 : index
    %4 = vector.load %arg3[%c0_3, %c0_4] : memref<1x256xf32, #tpu.memory_space<vmem>>, vector<1x256xf32>
    %5 = vector.broadcast %4 : vector<1x256xf32> to vector<16x256xf32>
    %6 = arith.addf %3, %5 : vector<16x256xf32>
    %cst_5 = arith.constant 0.000000e+00 : f32
    %7 = vector.broadcast %cst_5 : f32 to vector<16x256xf32>
    %8 = arith.maximumf %6, %7 : vector<16x256xf32>
    %9 = arith.truncf %8 : vector<16x256xf32> to vector<16x256xbf16>
    %c0_6 = arith.constant 0 : index
    %c0_7 = arith.constant 0 : index
    %10 = vector.load %arg4[%c0_6, %c0_7] : memref<256x128xbf16, #tpu.memory_space<vmem>>, vector<256x128xbf16>
    %cst_8 = arith.constant dense<0.000000e+00> : vector<16x128xf32>
    %11 = tpu.matmul %9, %10, %cst_8 {dimension_numbers = #tpu.dot_dimension_numbers<[1], [0], [0], [1], [0, 0, 1, 1], [], []>} : vector<16x256xbf16>, vector<256x128xbf16>, vector<16x128xf32> -> vector<16x128xf32>
    %c0_9 = arith.constant 0 : index
    %c0_10 = arith.constant 0 : index
    %12 = vector.load %arg5[%c0_9, %c0_10] : memref<1x128xf32, #tpu.memory_space<vmem>>, vector<1x128xf32>
    %13 = vector.broadcast %12 : vector<1x128xf32> to vector<16x128xf32>
    %14 = arith.addf %11, %13 : vector<16x128xf32>
    %cst_11 = arith.constant 0.000000e+00 : f32
    %15 = vector.broadcast %cst_11 : f32 to vector<16x128xf32>
    %16 = arith.maximumf %14, %15 : vector<16x128xf32>
    %17 = arith.truncf %16 : vector<16x128xf32> to vector<16x128xbf16>
    %c0_12 = arith.constant 0 : index
    %c0_13 = arith.constant 0 : index
    %18 = vector.load %arg6[%c0_12, %c0_13] : memref<128x128xbf16, #tpu.memory_space<vmem>>, vector<128x128xbf16>
    %cst_14 = arith.constant dense<0.000000e+00> : vector<16x128xf32>
    %19 = tpu.matmul %17, %18, %cst_14 {dimension_numbers = #tpu.dot_dimension_numbers<[1], [0], [0], [1], [0, 0, 1, 1], [], []>} : vector<16x128xbf16>, vector<128x128xbf16>, vector<16x128xf32> -> vector<16x128xf32>
    %c0_15 = arith.constant 0 : index
    %c0_16 = arith.constant 0 : index
    %20 = vector.load %arg7[%c0_15, %c0_16] : memref<1x128xf32, #tpu.memory_space<vmem>>, vector<1x128xf32>
    %21 = vector.broadcast %20 : vector<1x128xf32> to vector<16x128xf32>
    %22 = arith.addf %19, %21 : vector<16x128xf32>
    %23 = math.tanh %22 : vector<16x128xf32>
    %24 = arith.truncf %23 : vector<16x128xf32> to vector<16x128xbf16>
    %c0_17 = arith.constant 0 : index
    %c0_18 = arith.constant 0 : index
    %25 = vector.load %arg8[%c0_17, %c0_18] : memref<16x128xbf16, #tpu.memory_space<vmem>>, vector<16x128xbf16>
    tpu.vector_store %arg8[%c0_17, %c0_18], %24 {strides = array<i32>} : memref<16x128xbf16, #tpu.memory_space<vmem>>, vector<16x128xbf16>,
    return
  }
  func.func @transform_0(%arg0: i32) -> (i32, i32) {
    %c0_i32 = arith.constant 0 : i32
    %c0_i32_0 = arith.constant 0 : i32
    return %arg0, %c0_i32 : i32, i32
  }
  func.func @transform_1(%arg0: i32) -> (i32, i32) {
    %c0_i32 = arith.constant 0 : i32
    %c0_i32_0 = arith.constant 0 : i32
    %c0_i32_1 = arith.constant 0 : i32
    return %c0_i32, %c0_i32_0 : i32, i32
  }
  func.func @transform_2(%arg0: i32) -> (i32, i32) {
    %c0_i32 = arith.constant 0 : i32
    %c0_i32_0 = arith.constant 0 : i32
    %c0_i32_1 = arith.constant 0 : i32
    return %c0_i32, %c0_i32_0 : i32, i32
  }
  func.func @transform_3(%arg0: i32) -> (i32, i32) {
    %c0_i32 = arith.constant 0 : i32
    %c0_i32_0 = arith.constant 0 : i32
    %c0_i32_1 = arith.constant 0 : i32
    return %c0_i32, %c0_i32_0 : i32, i32
  }
  func.func @transform_4(%arg0: i32) -> (i32, i32) {
    %c0_i32 = arith.constant 0 : i32
    %c0_i32_0 = arith.constant 0 : i32
    %c0_i32_1 = arith.constant 0 : i32
    return %c0_i32, %c0_i32_0 : i32, i32
  }
  func.func @transform_5(%arg0: i32) -> (i32, i32) {
    %c0_i32 = arith.constant 0 : i32
    %c0_i32_0 = arith.constant 0 : i32
    %c0_i32_1 = arith.constant 0 : i32
    return %c0_i32, %c0_i32_0 : i32, i32
  }
  func.func @transform_6(%arg0: i32) -> (i32, i32) {
    %c0_i32 = arith.constant 0 : i32
    %c0_i32_0 = arith.constant 0 : i32
    %c0_i32_1 = arith.constant 0 : i32
    return %c0_i32, %c0_i32_0 : i32, i32
  }
  func.func @transform_7(%arg0: i32) -> (i32, i32) {
    %c0_i32 = arith.constant 0 : i32
    %c0_i32_0 = arith.constant 0 : i32
    return %arg0, %c0_i32 : i32, i32
  }
}

</mosaic_0001>

<bundles_post_ra>
// kernel: forward.1
= control target key start
LH: loop header
LB: loop body
LE: loop exit
PB: predicated region body
PF: predicated region fallthrough
CT: control target
= control target key end

     0   :  { %12 = vsyncpa [#allocation3], 0  ;;  %s2474_s0 = inlined_call_operand.vmem [shape: f32[20,768], index: 0, kind: input, shape index: {}]   ;;  %s2475_s1 = inlined_call_operand.vmem [shape: bf16[768,256], index: 1, kind: input, shape index: {}]   ;;  %s2476_s2 = inlined_call_operand.vmem [shape: f32[1,256], index: 2, kind: input, shape index: {}]   ;;  %s2477_s3 = inlined_call_operand.vmem [shape: bf16[256,128], index: 3, kind: input, shape index: {}]   ;;  %s2478_s4 = inlined_call_operand.vmem [shape: f32[1,128], index: 4, kind: input, shape index: {}]   ;;  %s2479_s5 = inlined_call_operand.vmem [shape: bf16[128,128], index: 5, kind: input, shape index: {}]   ;;  %s2480_s6 = inlined_call_operand.vmem [shape: f32[1,128], index: 6, kind: input, shape index: {}]   ;;  %s2481_s7 = inlined_call_operand.hbm [shape: bf16[20,128], index: 7, kind: output, shape index: {}]  }
   0x1   :  { %14 = vsyncpa [#allocation3 + $0x1], 0  ;;  %s1974_s24 = smov 0   ;;  %s1976_s25 = smov 0  }
   0x2   :  { %s1978_s26 = smov 0   ;;  %s1980_s27 = smov 0  }
   0x3 LB: > { %s1995_s28 = sadd.s32 4294967295, %s1927_s27   ;;  %s1439_s29 = sadd.s32 4294967294, %s1927_s27   ;;  %s1927_s27 = sphi %s1980_s27, %s2487_s27   ;;  %s1923_s26 = sphi %s1978_s26, %s2486_s26   ;;  %s1919_s25 = sphi %s1976_s25, %s2485_s25   ;;  %s1915_s24 = sphi %s1974_s24, %s2484_s24  }
   0x4   : > { %s1999_s30 = sadd.s32 1, %s1927_s27   ;;  %s179_s8 = sadd.s32 1, %s1923_s26 }
   0x5   : > { %s176_s9 = ssub.s32 %s1927_s27, %s1999_s30  ;;  %p189_p0 = scmp.ne.s32.totalorder %s1923_s26, %s1919_s25 }
   0x6   : > { %p177_p1 = scmp.eq.s32.totalorder %s176_s9, 0  ;;  %p190_p2 = scmp.eq.s32.totalorder %s1995_s28, 1 }
   0x7   : > { %p195_p3 = scmp.ne.s32.totalorder %s1919_s25, %s1915_s24  ;;  %p196_p4 = scmp.eq.s32.totalorder %s1439_s29, 1 }
   0x8   : > { %s2010_s10 = scalar_select %p177_p1, %s1923_s26, %s179_s8  }
   0x9   : > { %p2012_p5 = por %p190_p2, %p189_p0  ;;  %p2016_p6 = por %p196_p4, %p195_p3 }
   0xa   : > { %p1442_p7 = scmp.ge.s32.totalorder %s1927_s27, 1  ;;  %p252_p8 = scmp.lt.s32.totalorder %s1927_s27, 3 }
   0xc   : > { %p253_p9 = pnand %p1442_p7, %p252_p8 }
   0xd   : > { %v1693_v0 = vld [vmem:[%s2475_s1 + $0x104] ss:$8 sps:$4 sm:$0xff] (!%p253_p9)   ;;  %v1695_v1 = vld [vmem:[%s2475_s1 + $0x100] ss:$8 sps:$4 sm:$0xff] (!%p253_p9)   ;;  %v1696_v2 = vld [vmem:[%s2475_s1 + $0x114] ss:$8 sps:$4 sm:$0xff] (!%p253_p9)  }
   0xe   : > { %256 = sbr.rel (%p253_p9) target bundleno = 845 (0x34d), region = 48  ;;  %962 = vmatprep.subr.bf16.mxu0 (!%p253_p9), %v1693_v0  ;;  %v1698_v3 = vld [vmem:[%s2475_s1 + $0x110] ss:$8 sps:$4 sm:$0xff] (!%p253_p9)   ;;  %v1699_v4 = vld [vmem:[%s2475_s1 + $0x124] ss:$8 sps:$4 sm:$0xff] (!%p253_p9)   ;;  %s2038_s23 = sshll.u32 (!%p253_p9), %s1995_s28, 1 }
   0xf   : > { %963 = vmatpush1.bf16.msra.mxu0 (!%p253_p9), %v1695_v1  ;;  %v1701_v5 = vld [vmem:[%s2475_s1 + $0x120] ss:$8 sps:$4 sm:$0xff] (!%p253_p9)   ;;  %v1702_v6 = vld [vmem:[%s2475_s1 + $0x134] ss:$8 sps:$4 sm:$0xff] (!%p253_p9)   ;;  %p296_p10 = scmp.lt.s32.totalorder (!%p253_p9), %s2038_s23, 2  ;;  %vm1930_vm0 = vmmov (!%p253_p9), 0  }
  0x10   : > { %964 = vmatprep.subr.bf16.mxu0 (!%p253_p9), %v1696_v2  ;;  %v1704_v7 = vld [vmem:[%s2475_s1 + $0x130] ss:$8 sps:$4 sm:$0xff] (!%p253_p9)   ;;  %v1705_v8 = vld [vmem:[%s2475_s1 + $0x144] ss:$8 sps:$4 sm:$0xff] (!%p253_p9)   ;;  %v1707_v9 = vld [vmem:[%s2475_s1 + $0x140] ss:$8 sps:$4 sm:$0xff] (!%p253_p9)  }
  0x11   : > { %v1708_v10 = vld [vmem:[%s2475_s1 + $0x154] ss:$8 sps:$4 sm:$0xff] (!%p253_p9)   ;;  %v1710_v11 = vld [vmem:[%s2475_s1 + $0x150] ss:$8 sps:$4 sm:$0xff] (!%p253_p9)   ;;  %v1711_v12 = vld [vmem:[%s2475_s1 + $0x164] ss:$8 sps:$4 sm:$0xff] (!%p253_p9)  }
  0x12   : > { %v1738_v13 = vld [vmem:[%s2475_s1 + $0x4] ss:$8 sps:$4 sm:$0xff] (!%p253_p9)   ;;  %v1740_v14 = vld [vmem:[%s2475_s1] ss:$8 sps:$4 sm:$0xff] (!%p253_p9)   ;;  %v1714_v16 = vld [vmem:[%s2475_s1 + $0x174] ss:$8 sps:$4 sm:$0xff] (!%p253_p9)  }
  0x13   : > { %965 = vmatpush1.bf16.msra.mxu0 (!%p253_p9), %v1698_v3  ;;  %v1713_v15 = vld [vmem:[%s2475_s1 + $0x160] ss:$8 sps:$4 sm:$0xff] (!%p253_p9)   ;;  %919 = vmatprep.subr.bf16.mxu1 (!%p253_p9), %v1738_v13  ;;  %v1744_v17 = vld [vmem:[%s2475_s1 + $0x14] ss:$8 sps:$4 sm:$0xff] (!%p253_p9)   ;;  %v1746_v18 = vld [vmem:[%s2475_s1 + $0x10] ss:$8 sps:$4 sm:$0xff] (!%p253_p9)  }
  0x14   : > { %966 = vmatprep.subr.bf16.mxu0 (!%p253_p9), %v1699_v4  ;;  %920 = vmatpush1.bf16.msra.mxu1 (!%p253_p9), %v1740_v14  ;;  %v1716_v22 = vld [vmem:[%s2475_s1 + $0x170] ss:$8 sps:$4 sm:$0xff] (!%p253_p9)   ;;  %v1750_v23 = vld [vmem:[%s2475_s1 + $0x24] ss:$8 sps:$4 sm:$0xff] (!%p253_p9)   ;;  %v1752_v24 = vld [vmem:[%s2475_s1 + $0x20] ss:$8 sps:$4 sm:$0xff] (!%p253_p9)  }
  0x15   : > { %s297_s18 = scalar_select %p296_p10, %s2038_s23, 2  ;;  %921 = vmatprep.subr.bf16.mxu1 %v1744_v17  ;;  %v1717_v25 = vld [vmem:[%s2475_s1 + $0x184] ss:$8 sps:$4 sm:$0xff]   ;;  %v1719_v26 = vld [vmem:[%s2475_s1 + $0x180] ss:$8 sps:$4 sm:$0xff]  }
  0x16   : > { %v1756_v27 = vld [vmem:[%s2475_s1 + $0x34] ss:$8 sps:$4 sm:$0xff]   ;;  %v1758_v29 = vld [vmem:[%s2475_s1 + $0x30] ss:$8 sps:$4 sm:$0xff]   ;;  %v1762_v30 = vld [vmem:[%s2475_s1 + $0x44] ss:$8 sps:$4 sm:$0xff]  }
  0x17   : > { %967 = vmatpush1.bf16.msra.mxu0 %v1701_v5  ;;  %s1650_s29 = smul.u32 48, %s297_s18  ;;  %v1720_v28 = vld [vmem:[%s2475_s1 + $0x194] ss:$8 sps:$4 sm:$0xff]   ;;  %v1722_v31 = vld [vmem:[%s2475_s1 + $0x190] ss:$8 sps:$4 sm:$0xff]   ;;  %s1366_s8 = ssub.s32 (%p2012_p5), 3, %s2038_s23 }
  0x18   : > { %968 = vmatprep.subr.bf16.mxu0 %v1702_v6  ;;  %922 = vmatpush1.bf16.msra.mxu1 %v1746_v18  ;;  %v1723_v32 = vld [vmem:[%s2475_s1 + $0x1a4] ss:$8 sps:$4 sm:$0xff]   ;;  %v1764_v33 = vld [vmem:[%s2475_s1 + $0x40] ss:$8 sps:$4 sm:$0xff]   ;;  %v1768_v34 = vld [vmem:[%s2475_s1 + $0x54] ss:$8 sps:$4 sm:$0xff]  }
  0x19   : > { %s2075_s21 = scalar_lea.vmem %s2474_s0, %s1650_s29  ;;  %923 = vmatprep.subr.bf16.mxu1 %v1750_v23  ;;  %v1725_v35 = vld [vmem:[%s2475_s1 + $0x1a0] ss:$8 sps:$4 sm:$0xff]   ;;  %v1726_v36 = vld [vmem:[%s2475_s1 + $0x1b4] ss:$8 sps:$4 sm:$0xff]   ;;  %v1770_v37 = vld [vmem:[%s2475_s1 + $0x50] ss:$8 sps:$4 sm:$0xff]  }
  0x1a   : > { %v316_v19 = vld [vmem:[%s2075_s21 + $0x18] sm:$0xff]  ;;  %v322_v20 = vld [vmem:[%s2075_s21 + $0x48] sm:$0xff]  ;;  %v315_v57 = vld [vmem:[%s2075_s21 + $0x10] sm:$0xff]  ;;  %s287_s29 = sand.u32 1, %s1919_s25   ;;  %p1367_p11 = scmp.lt.s32.totalorder (%p2012_p5), %s1366_s8, 2 }
  0x1b   : > { %969 = vmatpush1.bf16.msra.mxu0 %v1704_v7  ;;  %v328_v21 = vpack.c.bf16 %v322_v20, %v316_v19  ;;  %v1774_v38 = vld [vmem:[%s2475_s1 + $0x64] ss:$8 sps:$4 sm:$0xff]   ;;  %v1728_v39 = vld [vmem:[%s2475_s1 + $0x1b0] ss:$8 sps:$4 sm:$0xff]   ;;  %v1776_v41 = vld [vmem:[%s2475_s1 + $0x60] ss:$8 sps:$4 sm:$0xff]  }
  0x1c   : > { %970 = vmatprep.subr.bf16.mxu0 %v1705_v8  ;;  %924 = vmatpush1.bf16.msra.mxu1 %v1752_v24  ;;  %v1729_v40 = vld [vmem:[%s2475_s1 + $0x1c4] ss:$8 sps:$4 sm:$0xff]   ;;  %v1780_v42 = vld [vmem:[%s2475_s1 + $0x74] ss:$8 sps:$4 sm:$0xff]   ;;  %v1731_v43 = vld [vmem:[%s2475_s1 + $0x1c0] ss:$8 sps:$4 sm:$0xff]  }
  0x1d   : > { %994 = vmatprep.mubr.bf16.mxu0 %v328_v21  ;;  %925 = vmatprep.subr.bf16.mxu1 %v1756_v27  ;;  %v1732_v44 = vld [vmem:[%s2475_s1 + $0x1d4] ss:$8 sps:$4 sm:$0xff]   ;;  %v1782_v45 = vld [vmem:[%s2475_s1 + $0x70] ss:$8 sps:$4 sm:$0xff]   ;;  %v1786_v46 = vld [vmem:[%s2475_s1 + $0x84] ss:$8 sps:$4 sm:$0xff]  }
  0x1e   : > { %v1734_v47 = vld [vmem:[%s2475_s1 + $0x1d0] ss:$8 sps:$4 sm:$0xff]   ;;  %v1735_v48 = vld [vmem:[%s2475_s1 + $0x1e4] ss:$8 sps:$4 sm:$0xff]   ;;  %v1788_v49 = vld [vmem:[%s2475_s1 + $0x80] ss:$8 sps:$4 sm:$0xff]  }
  0x1f   : > { %971 = vmatpush1.bf16.msra.mxu0 %v1707_v9  ;;  %v1792_v50 = vld [vmem:[%s2475_s1 + $0x94] ss:$8 sps:$4 sm:$0xff]   ;;  %v1737_v51 = vld [vmem:[%s2475_s1 + $0x1e0] ss:$8 sps:$4 sm:$0xff]   ;;  %v1794_v53 = vld [vmem:[%s2475_s1 + $0x90] ss:$8 sps:$4 sm:$0xff]  }
  0x20   : > { %972 = vmatprep.subr.bf16.mxu0 %v1708_v10  ;;  %926 = vmatpush1.bf16.msra.mxu1 %v1758_v29  ;;  %v1741_v52 = vld [vmem:[%s2475_s1 + $0x1f4] ss:$8 sps:$4 sm:$0xff]   ;;  %v1798_v54 = vld [vmem:[%s2475_s1 + $0xa4] ss:$8 sps:$4 sm:$0xff]   ;;  %v1743_v55 = vld [vmem:[%s2475_s1 + $0x1f0] ss:$8 sps:$4 sm:$0xff]  }
  0x21   : > { %927 = vmatprep.subr.bf16.mxu1 %v1762_v30  ;;  %v1749_v56 = vld [vmem:[%s2475_s1 + $0x204] ss:$8 sps:$4 sm:$0xff]   ;;  %v1800_v59 = vld [vmem:[%s2475_s1 + $0xa0] ss:$8 sps:$4 sm:$0xff]   ;;  %v1804_v60 = vld [vmem:[%s2475_s1 + $0xb4] ss:$8 sps:$4 sm:$0xff]  }
  0x22   : > { %v321_v58 = vld [vmem:[%s2075_s21 + $0x40] sm:$0xff]  ;;  %v1755_v63 = vld [vmem:[%s2475_s1 + $0x214] ss:$8 sps:$4 sm:$0xff]   ;;  %v1806_v0 = vld [vmem:[%s2475_s1 + $0xb0] ss:$8 sps:$4 sm:$0xff]   ;;  %s1443_s20 = sshll.u32 %s287_s29, 3 }
  0x23   : > { %973 = vmatpush1.bf16.msra.mxu0 %v1710_v11  ;;  %v1747_v61 = vld [vmem:[%s2475_s1 + $0x200] ss:$8 sps:$4 sm:$0xff]   ;;  %v327_v62 = vpack.c.bf16 %v321_v58, %v315_v57  ;;  %v1810_v1 = vld [vmem:[%s2475_s1 + $0xc4] ss:$8 sps:$4 sm:$0xff]   ;;  %v320_v3 = vld [vmem:[%s2075_s21 + $0x38] sm:$0xff]  ;;  %s289_s18 = scalar_lea.vmem [#allocation2], %s1443_s20 }
  0x24   : > { %974 = vmatprep.subr.bf16.mxu0 %v1711_v12  ;;  %928 = vmatpush1.bf16.msra.mxu1 %v1764_v33  ;;  %v314_v2 = vld [vmem:[%s2075_s21 + $0x8] sm:$0xff]  ;;  %v1753_v5 = vld [vmem:[%s2475_s1 + $0x210] ss:$8 sps:$4 sm:$0xff]   ;;  %v1816_v10 = vld [vmem:[%s2475_s1 + $0xd4] ss:$8 sps:$4 sm:$0xff]   ;;  %s2414_s22 = scalar_lea.sflag [#allocation3], %s287_s29 }
  0x25   : > { %929 = vmatprep.subr.bf16.mxu1 %v1768_v34  ;;  %v326_v4 = vpack.c.bf16 %v320_v3, %v314_v2  ;;  %v318_v6 = vld [vmem:[%s2075_s21 + $0x28] sm:$0xff]  ;;  %v324_v9 = vld [vmem:[%s2075_s21 + $0x58] sm:$0xff]  ;;  %v319_v23 = vld [vmem:[%s2075_s21 + $0x30] sm:$0xff]  ;;  %v1929_v2 = vmov 0.0  }
  0x26   : > { %v1761_v7 = vld [vmem:[%s2475_s1 + $0x224] ss:$8 sps:$4 sm:$0xff]   ;;  %v1812_v8 = vld [vmem:[%s2475_s1 + $0xc0] ss:$8 sps:$4 sm:$0xff]   ;;  %v330_v11 = vpack.c.bf16 %v324_v9, %v318_v6  ;;  %v1767_v13 = vld [vmem:[%s2475_s1 + $0x234] ss:$8 sps:$4 sm:$0xff]  }
  0x27   : > { %975 = vmatpush1.bf16.msra.mxu0 %v1713_v15  ;;  %v1759_v12 = vld [vmem:[%s2475_s1 + $0x220] ss:$8 sps:$4 sm:$0xff]   ;;  %951 = vmatprep.mubr.bf16.mxu1 %v326_v4  ;;  %v1818_v14 = vld [vmem:[%s2475_s1 + $0xd0] ss:$8 sps:$4 sm:$0xff]   ;;  %v1822_v15 = vld [vmem:[%s2475_s1 + $0xe4] ss:$8 sps:$4 sm:$0xff]  }
  0x28   : > { %976 = vmatprep.subr.bf16.mxu0 %v1714_v16  ;;  %930 = vmatpush1.bf16.msra.mxu1 %v1770_v37  ;;  %v1765_v16 = vld [vmem:[%s2475_s1 + $0x230] ss:$8 sps:$4 sm:$0xff]   ;;  %v1773_v17 = vld [vmem:[%s2475_s1 + $0x244] ss:$8 sps:$4 sm:$0xff]   ;;  %v1824_v18 = vld [vmem:[%s2475_s1 + $0xe0] ss:$8 sps:$4 sm:$0xff]  }
  0x29   : > { %931 = vmatprep.subr.bf16.mxu1 %v1774_v38  ;;  %v1828_v19 = vld [vmem:[%s2475_s1 + $0xf4] ss:$8 sps:$4 sm:$0xff]   ;;  %v1771_v20 = vld [vmem:[%s2475_s1 + $0x240] ss:$8 sps:$4 sm:$0xff]   ;;  %v1830_v21 = vld [vmem:[%s2475_s1 + $0xf0] ss:$8 sps:$4 sm:$0xff]  }
  0x2a   : > { %v1779_v24 = vld [vmem:[%s2475_s1 + $0x254] ss:$8 sps:$4 sm:$0xff]   ;;  %v1838_v27 = vld [vmem:[%s2477_s3] sm:$0xff]   ;;  %v1839_v30 = vld [vmem:[%s2477_s3 + $0x48] sm:$0xff]  }
  0x2b   : > { %977 = vmatpush1.bf16.msra.mxu0 %v1716_v22  ;;  %v313_v22 = vld [vmem:[%s2075_s21] sm:$0xff]  ;;  %v1791_v33 = vld [vmem:[%s2475_s1 + $0x274] ss:$8 sps:$4 sm:$0xff]  }
  0x2c   : > { %978 = vmatprep.subr.bf16.mxu0 %v1717_v25  ;;  %932 = vmatpush1.bf16.msra.mxu1 %v1776_v41  ;;  %v1837_v25 = vld [vmem:[%s2477_s3 + $0x40] sm:$0xff]   ;;  %v325_v29 = vpack.c.bf16 %v319_v23, %v313_v22  ;;  %v1841_v34 = vld [vmem:[%s2477_s3 + $0x50] sm:$0xff]   ;;  %v1843_v38 = vld [vmem:[%s2477_s3 + $0x58] sm:$0xff]  }
  0x2d   : > { %933 = vmatprep.subr.bf16.mxu1 %v1780_v42  ;;  %v1797_v37 = vld [vmem:[%s2475_s1 + $0x284] ss:$8 sps:$4 sm:$0xff]   ;;  %v1803_v41 = vld [vmem:[%s2475_s1 + $0x294] ss:$8 sps:$4 sm:$0xff]   ;;  %v1801_v42 = vld [vmem:[%s2475_s1 + $0x290] ss:$8 sps:$4 sm:$0xff]  }
  0x2e   : > { %v1845_v58 = vld [vmem:[%s2477_s3 + $0x60] sm:$0xff]  }
  0x2f   : > { %979 = vmatpush1.bf16.msra.mxu0 %v1719_v26  ;;  %v1777_v26 = vld [vmem:[%s2475_s1 + $0x250] ss:$8 sps:$4 sm:$0xff]  }
  0x30   : > { %980 = vmatprep.subr.bf16.mxu0 %v1720_v28  ;;  %934 = vmatpush1.bf16.msra.mxu1 %v1782_v45  ;;  %v1785_v28 = vld [vmem:[%s2475_s1 + $0x264] ss:$8 sps:$4 sm:$0xff]   ;;  %v1815_v45 = vld [vmem:[%s2475_s1 + $0x2b4] ss:$8 sps:$4 sm:$0xff]  }
  0x31   : > { %935 = vmatprep.subr.bf16.mxu1 %v1786_v46  ;;  %v1813_v46 = vld [vmem:[%s2475_s1 + $0x2b0] ss:$8 sps:$4 sm:$0xff]  }
  0x33   : > { %981 = vmatpush1.bf16.msra.mxu0 %v1722_v31  ;;  %v1783_v31 = vld [vmem:[%s2475_s1 + $0x260] ss:$8 sps:$4 sm:$0xff]  }
  0x34   : > { %982 = vmatprep.subr.bf16.mxu0 %v1723_v32  ;;  %936 = vmatpush1.bf16.msra.mxu1 %v1788_v49  ;;  %v1840_v32 = vld [vmem:[%s2477_s3 + $0x8] sm:$0xff]   ;;  %v1827_v49 = vld [vmem:[%s2475_s1 + $0x2d4] ss:$8 sps:$4 sm:$0xff]  }
  0x35   : > { %937 = vmatprep.subr.bf16.mxu1 %v1792_v50  ;;  %v1825_v50 = vld [vmem:[%s2475_s1 + $0x2d0] ss:$8 sps:$4 sm:$0xff]  }
  0x37   : > { %983 = vmatpush1.bf16.msra.mxu0 %v1725_v35  ;;  %v1789_v35 = vld [vmem:[%s2475_s1 + $0x270] ss:$8 sps:$4 sm:$0xff]  }
  0x38   : > { %984 = vmatprep.subr.bf16.mxu0 %v1726_v36  ;;  %938 = vmatpush1.bf16.msra.mxu1 %v1794_v53  ;;  %v1842_v36 = vld [vmem:[%s2477_s3 + $0x10] sm:$0xff]  }
  0x39   : > { %939 = vmatprep.subr.bf16.mxu1 %v1798_v54  ;;  %v1836_v53 = vld [vmem:[%s2475_s1 + $0x2f4] ss:$8 sps:$4 sm:$0xff]   ;;  %v1834_v54 = vld [vmem:[%s2475_s1 + $0x2f0] ss:$8 sps:$4 sm:$0xff]  }
  0x3b   : > { %985 = vmatpush1.bf16.msra.mxu0 %v1728_v39  ;;  %v1795_v39 = vld [vmem:[%s2475_s1 + $0x280] ss:$8 sps:$4 sm:$0xff]  }
  0x3c   : > { %986 = vmatprep.subr.bf16.mxu0 %v1729_v40  ;;  %940 = vmatpush1.bf16.msra.mxu1 %v1800_v59  ;;  %v1844_v40 = vld [vmem:[%s2477_s3 + $0x18] sm:$0xff]   ;;  %v1846_v59 = vld [vmem:[%s2477_s3 + $0x20] sm:$0xff]  }
  0x3d   : > { %941 = vmatprep.subr.bf16.mxu1 %v1804_v60  ;;  %v1847_v60 = vld [vmem:[%s2477_s3 + $0x68] sm:$0xff]  }
  0x3f   : > { %987 = vmatpush1.bf16.msra.mxu0 %v1731_v43  ;;  %v1809_v43 = vld [vmem:[%s2475_s1 + $0x2a4] ss:$8 sps:$4 sm:$0xff]  }
  0x40   : > { %988 = vmatprep.subr.bf16.mxu0 %v1732_v44  ;;  %942 = vmatpush1.bf16.msra.mxu1 %v1806_v0  ;;  %v1807_v44 = vld [vmem:[%s2475_s1 + $0x2a0] ss:$8 sps:$4 sm:$0xff]   ;;  %v1851_v0 = vld [vmem:[%s2477_s3 + $0x78] sm:$0xff]  }
  0x41   : > { %943 = vmatprep.subr.bf16.mxu1 %v1810_v1  ;;  %v1852_v1 = vld [vmem:[%s2477_s3 + $0x38] sm:$0xff]  }
  0x43   : > { %989 = vmatpush1.bf16.msra.mxu0 %v1734_v47  ;;  %v1821_v47 = vld [vmem:[%s2475_s1 + $0x2c4] ss:$8 sps:$4 sm:$0xff]  }
  0x44   : > { %990 = vmatprep.subr.bf16.mxu0 %v1735_v48  ;;  %944 = vmatpush1.bf16.msra.mxu1 %v1812_v8  ;;  %v1819_v48 = vld [vmem:[%s2475_s1 + $0x2c0] ss:$8 sps:$4 sm:$0xff]  }
  0x45   : > { %945 = vmatprep.subr.bf16.mxu1 %v1816_v10  ;;  %v427_v10 = vld [vmem:[%s2476_s2] sm:$0x3] }
  0x47   : > { %991 = vmatpush1.bf16.msra.mxu0 %v1737_v51  ;;  %v1833_v51 = vld [vmem:[%s2475_s1 + $0x2e4] ss:$8 sps:$4 sm:$0xff]  }
  0x48   : > { %992 = vmatprep.subr.bf16.mxu0 %v1741_v52  ;;  %946 = vmatpush1.bf16.msra.mxu1 %v1818_v14  ;;  %v1831_v52 = vld [vmem:[%s2475_s1 + $0x2e0] ss:$8 sps:$4 sm:$0xff]  }
  0x49   : > { %947 = vmatprep.subr.bf16.mxu1 %v1822_v15 }
  0x4b   : > { %993 = vmatpush1.bf16.msra.mxu0 %v1743_v55  ;;  %v317_v55 = vld [vmem:[%s2075_s21 + $0x20] sm:$0xff] }
  0x4c   : > { %1005 = vmatprep.subr.bf16.mxu0 %v1749_v56  ;;  %948 = vmatpush1.bf16.msra.mxu1 %v1824_v18  ;;  %v323_v56 = vld [vmem:[%s2075_s21 + $0x50] sm:$0xff] }
  0x4d   : > { %949 = vmatprep.subr.bf16.mxu1 %v1828_v19  ;;  %v329_v57 = vpack.c.bf16 %v323_v56, %v317_v55 }
  0x4e   : > { %995 = vmatmul.mubr.bf16.vlgmr.msra.gmra.mrb[0].mxu0 %v327_v62  ;;  %v1849_v62 = vld [vmem:[%s2477_s3 + $0x70] sm:$0xff]  }
  0x4f   : > { %1006 = vmatpush1.bf16.msra.mxu0 %v1747_v61  ;;  %1037 = vmatprep.mubr.bf16.mxu0 %v330_v11  ;;  %v1848_v61 = vld [vmem:[%s2477_s3 + $0x28] sm:$0xff]  }
  0x50   : > { %1007 = vmatprep.subr.bf16.mxu0 %v1755_v63  ;;  %950 = vmatpush1.bf16.msra.mxu1 %v1830_v21  ;;  %v1850_v63 = vld [vmem:[%s2477_s3 + $0x30] sm:$0xff]  }
  0x51   : > { %1587 = vmatprep.subr.bf16.mxu1 %v1837_v25 }
  0x53   : > { %1008 = vmatpush1.bf16.msra.mxu0 %v1753_v5  ;;  %952 = vmatmul.mubr.bf16.vlgmr.msra.gmra.mrb[0].mxu1 %v325_v29 }
  0x54   : > { %1009 = vmatprep.subr.bf16.mxu0 %v1761_v7  ;;  %1588 = vmatpush3.bf16.msra.mxu1 %v1838_v27  ;;  %v429_v7 = vlaneseq }
  0x55   : > { %1589 = vmatprep.subr.bf16.mxu1 %v1839_v30 }
  0x56   : > { %v430_v8 = vshrl.u32 %v429_v7, 7 }
  0x57   : > { %1010 = vmatpush1.bf16.msra.mxu0 %v1759_v12 }
  0x58   : > { %1011 = vmatprep.subr.bf16.mxu0 %v1767_v13  ;;  %1590 = vmatpush3.bf16.msra.mxu1 %v1840_v32  ;;  %v431_v9 = vsub.s32 0, %v430_v8  ;;  %v435_v11 = vsub.s32 1, %v430_v8  ;;  %v1853_v32 = vld [vmem:[%s2479_s5] sm:$0xff]  }
  0x59   : > { %1591 = vmatprep.subr.bf16.mxu1 %v1841_v34  ;;  %v1855_v34 = vld [vmem:[%s2479_s5 + $0x10] sm:$0xff]  }
  0x5a   : > { %v432_v12 = vrot.slane %v427_v10, %v431_v9  ;;  %v436_v13 = vrot.slane %v427_v10, %v435_v11 }
  0x5b   : > { %1012 = vmatpush1.bf16.msra.mxu0 %v1765_v16 }
  0x5c   : > { %1013 = vmatprep.subr.bf16.mxu0 %v1773_v17  ;;  %1592 = vmatpush3.bf16.msra.mxu1 %v1842_v36  ;;  %v1857_v36 = vld [vmem:[%s2479_s5 + $0x20] sm:$0xff]  }
  0x5d   : > { %1593 = vmatprep.subr.bf16.mxu1 %v1843_v38  ;;  %v1859_v38 = vld [vmem:[%s2479_s5 + $0x30] sm:$0xff]  }
  0x5f   : > { %1014 = vmatpush1.bf16.msra.mxu0 %v1771_v20 }
  0x60   : > { %1015 = vmatprep.subr.bf16.mxu0 %v1779_v24  ;;  %1594 = vmatpush3.bf16.msra.mxu1 %v1844_v40 }
  0x61   : > { %1595 = vmatprep.subr.bf16.mxu1 %v1845_v58 }
  0x63   : > { %1016 = vmatpush1.bf16.msra.mxu0 %v1777_v26 }
  0x64   : > { %1017 = vmatprep.subr.bf16.mxu0 %v1785_v28  ;;  %1596 = vmatpush3.bf16.msra.mxu1 %v1846_v59 }
  0x65   : > { %1597 = vmatprep.subr.bf16.mxu1 %v1847_v60 }
  0x67   : > { %1018 = vmatpush1.bf16.msra.mxu0 %v1783_v31 }
  0x68   : > { %1019 = vmatprep.subr.bf16.mxu0 %v1791_v33  ;;  %1598 = vmatpush3.bf16.msra.mxu1 %v1848_v61  ;;  %v1854_v33 = vld [vmem:[%s2479_s5 + $0x8] sm:$0xff]  }
  0x69   : > { %1599 = vmatprep.subr.bf16.mxu1 %v1849_v62 }
  0x6b   : > { %1020 = vmatpush1.bf16.msra.mxu0 %v1789_v35  ;;  %v1856_v35 = vld [vmem:[%s2479_s5 + $0x18] sm:$0xff]  }
  0x6c   : > { %1021 = vmatprep.subr.bf16.mxu0 %v1797_v37  ;;  %1600 = vmatpush3.bf16.msra.mxu1 %v1850_v63  ;;  %v1858_v37 = vld [vmem:[%s2479_s5 + $0x28] sm:$0xff]  }
  0x6d   : > { %1601 = vmatprep.subr.bf16.mxu1 %v1851_v0 }
  0x6f   : > { %1022 = vmatpush1.bf16.msra.mxu0 %v1795_v39  ;;  %v1860_v39 = vld [vmem:[%s2479_s5 + $0x38] sm:$0xff]  }
  0x70   : > { %1023 = vmatprep.subr.bf16.mxu0 %v1803_v41  ;;  %1602 = vmatpush3.bf16.msra.mxu1 %v1852_v1  ;;  %v1542_v41 = vld [vmem:[%s2478_s4] ss:$0 sm:$0xff] }
  0x71   : > { %1618 = vmatprep.subr.bf16.mxu1 %v1929_v2 }
  0x73   : > { %1024 = vmatpush1.bf16.msra.mxu0 %v1801_v42 }
  0x74   : > { %1025 = vmatprep.subr.bf16.mxu0 %v1809_v43 }
  0x77   : > { %1026 = vmatpush1.bf16.msra.mxu0 %v1807_v44 }
  0x78   : > { %1027 = vmatprep.subr.bf16.mxu0 %v1815_v45 }
  0x7b   : > { %1028 = vmatpush1.bf16.msra.mxu0 %v1813_v46 }
  0x7c   : > { %1029 = vmatprep.subr.bf16.mxu0 %v1821_v47 }
  0x7f   : > { %1030 = vmatpush1.bf16.msra.mxu0 %v1819_v48 }
  0x80   : > { %1031 = vmatprep.subr.bf16.mxu0 %v1827_v49 }
  0x83   : > { %1032 = vmatpush1.bf16.msra.mxu0 %v1825_v50 }
  0x84   : > { %1033 = vmatprep.subr.bf16.mxu0 %v1833_v51 }
  0x87   : > { %1034 = vmatpush1.bf16.msra.mxu0 %v1831_v52  ;;  %v1559_v52 = vld [vmem:[%s2480_s6] ss:$0 sm:$0xff] }
  0x88   : > { %1035 = vmatprep.subr.bf16.mxu0 %v1836_v53 }
  0x8b   : > { %1036 = vmatpush1.bf16.msra.mxu0 %v1834_v54 }
  0x8e   : > { %1038 = vmatmul.mubr.bf16.vlgmr.msra.gmra.mrb[0].mxu0 %v329_v57 }
 0x126   : > { %v953_v3 = vpop.f32.mrb[0].mxu1 }
 0x127   : > { %v955_v4 = vpop.f32.mrb[1].mxu1  ;;  %v954_v14 = vadd.f32 %v953_v3, %v432_v12 }
 0x128   : > { %v957_v5 = vpop.f32.mrb[2].mxu1  ;;  %v956_v15 = vadd.f32 %v955_v4, %v436_v13 }
 0x129   : > { %v959_v6 = vpop.f32.mrb[3].mxu1  ;;  %v958_v17 = vadd.f32 %v957_v5, %v432_v12 }
 0x12a   : > { %v960_v20 = vadd.f32 %v959_v6, %v436_v13 }
 0x161   : > { %v1039_v16 = vpop.f32.mrb[0].mxu0 }
 0x162   : > { %v1639_v18 = vadd.f32 %v1039_v16, %v954_v14  ;;  %v1041_v19 = vpop.f32.mrb[1].mxu0 }
 0x163   : > { %v1641_v21 = vadd.f32 %v1041_v19, %v956_v15  ;;  %v1043_v22 = vpop.f32.mrb[2].mxu0 }
 0x164   : > { %v1643_v23 = vadd.f32 %v1043_v22, %v958_v17  ;;  %v1045_v24 = vpop.f32.mrb[3].mxu0  ;;  %v1048_v26 = vmax.f32 %v1639_v18, 0.0 }
 0x165   : > { %v1645_v25 = vadd.f32 %v1045_v24, %v960_v20  ;;  %v1049_v28 = vmax.f32 %v1641_v21, 0.0 }
 0x166   : > { %v1050_v27 = vmax.f32 %v1643_v23, 0.0 }
 0x167   : > { %v1051_v29 = vmax.f32 %v1645_v25, 0.0 }
 0x168   : > { %v1052_v30 = vpack.c.bf16 %v1050_v27, %v1048_v26 }
 0x169   : > { %v1053_v31 = vpack.c.bf16 %v1051_v29, %v1049_v28 }
 0x16b   : > { %1221 = vmatprep.mubr.bf16.mxu1 %v1053_v31 }
 0x16c   : > { %1222 = vmatmul.mubr.bf16.vlgmr.msra.gmra.mrb[4].mxu1 %v1052_v30 }
 0x16d   : > { %1619 = vmatpush3.bf16.msra.mxu1 %v1853_v32  ;;  %1634 = vmatprep.mubr.msk.bf16.mxu1 %vm1930_vm0, %v1929_v2 }
 0x16e   : > { %1620 = vmatprep.subr.bf16.mxu1 %v1929_v2 }
 0x171   : > { %1621 = vmatpush3.bf16.msra.mxu1 %v1854_v33 }
 0x172   : > { %1622 = vmatprep.subr.bf16.mxu1 %v1929_v2 }
 0x175   : > { %1623 = vmatpush3.bf16.msra.mxu1 %v1855_v34 }
 0x176   : > { %1624 = vmatprep.subr.bf16.mxu1 %v1929_v2 }
 0x179   : > { %1625 = vmatpush3.bf16.msra.mxu1 %v1856_v35 }
 0x17a   : > { %1626 = vmatprep.subr.bf16.mxu1 %v1929_v2 }
 0x17d   : > { %1627 = vmatpush3.bf16.msra.mxu1 %v1857_v36 }
 0x17e   : > { %1628 = vmatprep.subr.bf16.mxu1 %v1929_v2 }
 0x181   : > { %1629 = vmatpush3.bf16.msra.mxu1 %v1858_v37 }
 0x182   : > { %1630 = vmatprep.subr.bf16.mxu1 %v1929_v2 }
 0x185   : > { %1631 = vmatpush3.bf16.msra.mxu1 %v1859_v38 }
 0x186   : > { %1632 = vmatprep.subr.bf16.mxu1 %v1929_v2 }
 0x189   : > { %1633 = vmatpush3.bf16.msra.mxu1 %v1860_v39 }
 0x23f   : > { %v1603_v40 = vpop.f32.mrb[4].mxu1 }
 0x240   : > { %v1604_v42 = vpop.f32.mrb[5].mxu1 }
 0x241   : > { %v1605_v43 = vadd.f32 %v1604_v42, %v1603_v40  ;;  %v1606_v44 = vpop.f32.mrb[6].mxu1 }
 0x242   : > { %v1607_v45 = vpop.f32.mrb[7].mxu1 }
 0x243   : > { %v1224_v46 = vadd.f32 %v1605_v43, %v1542_v41  ;;  %v1608_v47 = vadd.f32 %v1607_v45, %v1606_v44 }
 0x245   : > { %v1227_v48 = vadd.f32 %v1608_v47, %v1542_v41  ;;  %v1230_v49 = vmax.f32 %v1224_v46, 0.0 }
 0x247   : > { %v1231_v50 = vmax.f32 %v1227_v48, 0.0 }
 0x249   : > { %v1232_v51 = vpack.c.bf16 %v1231_v50, %v1230_v49 }
 0x24b   : > { %1635 = vmatmul.mubr.bf16.vlgmr.msra.gmra.mrb[8].mxu1 %v1232_v51 }
 0x31e   : > { %v1338_v53 = vpop.f32.mrb[8].mxu1 }
 0x31f   : > { %v1339_v54 = vadd.f32 %v1559_v52, %v1338_v53  ;;  %v1636_v55 = vpop.f32.mrb[9].mxu1 }
 0x320   : > { %v1341_v56 = vpop.f32.mrb[10].mxu1 }
 0x321   : > { %v1342_v57 = vadd.f32 %v1559_v52, %v1341_v56  ;;  %v1637_v58 = vpop.f32.mrb[11].mxu1  ;;  %1861 = vtanh.f32 %v1339_v54 }
 0x323   : > { %1863 = vtanh.f32 %v1342_v57 }
 0x32a   : > { %1364 = sbr.rel (!%p2012_p5) target bundleno = 845 (0x34d), region = 52 }
 0x32b   : > { %v1862_v59 = vpop.eup %1861 }
 0x32d   : > { %v1864_v60 = vpop.eup %1863 }
 0x32e   : > { %v1585_v61 = vpack.c.bf16 %v1864_v60, %v1862_v59 }
 0x330   : > { %1586 = vst [vmem:[%s289_s18] sm:$0xff] %v1585_v61  }
 0x331   : > { %s2489_s8 = smov (!%p1367_p11, %s1366_s8), 2 }
 0x332   : > { %s2419_s9 = sshll.u32 %s2489_s8, 6 }
 0x333   : > { %s1371_s13 = ssub.s32 128, %s2419_s9 }
 0x334   : > { %1372 = vsyncadd %s2414_s22, %s1371_s13  ;;  %p1573_p12 = scmp.ne.s32.totalorder %s2419_s9, 0  ;;  %s1581_s21 = sshll.u32 %s1995_s28, 7 }
 0x335   : > { %s2428_s11 = scalar_lea.hbm %s2481_s7, %s1581_s21  ;;  %s1377_s16 = sshll.u32 %s289_s18, 4  ;;  %s2430_s16 = int_to_ptr.vmem [resolvable:$true] %s1377_s16 }
 0x336   : > { %s1865_s23 = scalar_lea.vmem %s2430_s16, %s2419_s9  ;;  %s1931_s29 = smov [#allocation2]  }
 0x337   : > { %p1866_p13 = scmp.ne.s32.totalorder %s2430_s16, %s1865_s23  ;;  %s1869_s17 = sshll.u32 %s1931_s29, 4  ;;  %s1870_s17 = int_to_ptr.vmem [resolvable:$false] %s1869_s17 }
 0x338   : > { %s1871_s28 = scalar_lea.vmem %s1870_s17, 256  ;;  %p1872_p2 = scmp.lt.s32.totalorder %s2430_s16, %s1870_s17 }
 0x339   : > { %p1867_p0 = pnand %p1866_p13, %p1573_p12  ;;  %p1873_p3 = scmp.lt.s32.totalorder %s1871_s28, %s1865_s23 }
 0x33b   : > { %p1868_p1 = pneg %p1867_p0  ;;  %p1874_p4 = por %p1873_p3, %p1872_p2 }
 0x33d   : > { %p1875_p5 = pnand %p1874_p4, %p1868_p1 }
 0x33f   : > { %1878 = shalt.err (!%p1875_p5)
}
 0x340   : > { %s1879_s19 = scalar_lea.hbm %s2428_s11, %s2419_s9  ;;  %s1883_s8 = scalar_lea.hbm %s2481_s7, 192 }
 0x341   : > { %p1880_p7 = scmp.ne.s32.totalorder %s2428_s11, %s1879_s19  ;;  %p1884_p10 = scmp.lt.u32.totalorder %s2428_s11, %s2481_s7 }
 0x342   : > { %p1885_p11 = scmp.lt.u32.totalorder %s1883_s8, %s1879_s19  ;;  %p1887_p0 = scmp.lt.u32.totalorder %s1879_s19, %s2428_s11 }
 0x343   : > { %p1881_p8 = pnand %p1880_p7, %p1573_p12 }
 0x344   : > { %p1886_p13 = por %p1885_p11, %p1884_p10 }
 0x345   : > { %p1882_p9 = pneg %p1881_p8 }
 0x346   : > { %p1888_p1 = por %p1887_p0, %p1886_p13 }
 0x348   : > { %p1889_p2 = pnand %p1888_p1, %p1882_p9 }
 0x34a   : > { %1892 = shalt.err (!%p1889_p2)
}
 0x34b   : > { %s1932_s14 = smov 64   ;;  %s1933_s15 = smov 4  }
 0x34c   : > { %1383 = dma.vmem_to_hbm [thread:$0]  (%p1573_p12), %s2430_s16, %s2419_s9, %s2428_s11, %s2414_s22, %s1932_s14, %s1932_s14, %s1933_s15  }
 0x34d PF: > { %p1656_p3 = scmp.ge.s32.totalorder %s1927_s27, 2  ;;  %s1392_s23 = sand.u32 1, %s1915_s24  }
 0x34e   : > { %s1393_s29 = scalar_lea.sflag [#allocation3], %s1392_s23 }
 0x34f   : > { %p1653_p4 = pnand %p1656_p3, %p2016_p6 }
 0x351   : > { %1910 = dma.done.wait (!%p1653_p4), %s1393_s29, 128  }
 0x352   : > { %1912 = vsyncadd (!%p1653_p4), %s1393_s29, 4294967168  ;;  %p17_p5 = scmp.ge.s32.totalorder %s1999_s30, 4   ;;  %s2484_s24 = smov %s1919_s25 }
 0x353   : > { %s2485_s25 = smov %s1923_s26  ;;  %s2486_s26 = smov %s2010_s10 }
 0x354   : > { %s2487_s27 = smov %s1999_s30  ;;  %19 = sbr.rel (!%p17_p5) target bundleno = 3 (0x3), region = 83 }
 0x35b   :  { %1398 = vsyncpa [#allocation3], 1 }
 0x35c   :  { %1400 = vsyncpa [#allocation3 + $0x1], 1 }

</bundles_post_ra>
